<compile_context>
chip_gen: v6e
topology: v6e:2x2x1
jax: 0.10.0
libtpu: 0.0.40
codegen_flags: <defaults>
</compile_context>

<pallas_src>
import functools

import jax
import jax.numpy as jnp
import numpy as np
from jax.experimental import pallas as pl
from jax.experimental.pallas import tpu as pltpu

ALPHA = 0.01  # LeakyReLU negative slope


def _leaky(v):
    return jnp.where(v >= 0, v, ALPHA * v)


def inception_kernel(x_ref,
                     w12a_ref, b12a_ref,
                     w1b_ref, b1b_ref,
                     w2b_ref, b2b_ref, w2c_ref, b2c_ref,
                     w3_ref, b3_ref,
                     o_ref, *, n_per_step, width, n_filters):
    W = width
    F = n_filters
    HW = x_ref.shape[-1]

    def taps(y, fill):
        # y: (rows, H*W), H-major flattening.  Returns (y[h-1], y[h], y[h+1])
        # with `fill` at the H boundaries, via a padded (H+2)-row window.
        rows = y.shape[0]
        pad = jnp.full((rows, W), fill, dtype=y.dtype)
        ypad = jnp.concatenate([pad, y, pad], axis=1)        # (rows, HW + 2W)
        return (ypad[:, 0:HW],                               # y[h-1]
                ypad[:, W:W + HW],                           # y[h]
                ypad[:, 2 * W:2 * W + HW])                   # y[h+1]

    def conv31(y, wf_ref, b_ref):
        # (3,1) conv with padding (1,0) as a single fused matmul:
        #   out = Wf @ [tap0; tap1; tap2] + b,  Wf: (Cout, 3*Cin)
        t0, t1, t2 = taps(y, 0.0)
        ycat = jnp.concatenate([t0, t1, t2], axis=0)         # (3*rows, HW)
        return jnp.dot(wf_ref[...], ycat,
                       preferred_element_type=jnp.float32) + b_ref[...]

    for n in range(n_per_step):
        X = x_ref[n]                                         # (C, HW)

        # fused 1x1 convs of branches 1 and 2: (2F, C) @ (C, HW)
        y12 = _leaky(jnp.dot(w12a_ref[...], X,
                             preferred_element_type=jnp.float32) + b12a_ref[...])
        y1 = y12[0:F]
        y2 = y12[F:2 * F]

        # branch 1: 1x1 -> leaky -> (3,1) -> leaky
        x1 = _leaky(conv31(y1, w1b_ref, b1b_ref))

        # branch 2: 1x1 -> leaky -> (3,1) -> leaky -> (3,1) -> leaky
        y2 = _leaky(conv31(y2, w2b_ref, b2b_ref))
        x2 = _leaky(conv31(y2, w2c_ref, b2c_ref))

        # branch 3: maxpool (3,1)/s1/pad(1,0) (implicit -inf pad) -> (3,1) -> leaky
        m0, m1, m2 = taps(X, -jnp.inf)
        mp = jnp.maximum(jnp.maximum(m0, m1), m2)
        x3 = _leaky(conv31(mp, w3_ref, b3_ref))

        # write each branch into its channel slice: unmasked lane-dense stores,
        # no lane-axis concatenate.
        o_ref[n, 0:F, :] = x1
        o_ref[n, F:2 * F, :] = x2
        o_ref[n, 2 * F:3 * F, :] = x3


def inception_block_v2(x, params):
    """x: (N, C, H, W) float32 — same NCHW convention as the PyTorch module."""
    N, C, H, W = x.shape
    F = params["b1a"].shape[0]
    HW = H * W

    # Free reshape (merges contiguous trailing dims; no transpose / copy).
    x_flat = x.reshape(N, C, HW)

    # --- weight preprocessing (tiny, done once) ---
    def fuse3(wk):   # (3, Ci, Co) -> (Co, 3*Ci), matching the tap stacking order
        co, ci = wk.shape[2], wk.shape[1]
        return jnp.transpose(wk, (2, 0, 1)).reshape(co, 3 * ci)

    col = lambda b: b.reshape(-1, 1)

    w12a = jnp.concatenate([params["w1a"].T, params["w2a"].T], axis=0)   # (2F, C)
    b12a = jnp.concatenate([col(params["b1a"]), col(params["b2a"])], axis=0)

    weight_args = [
        w12a, b12a,
        fuse3(params["w1b"]), col(params["b1b"]),
        fuse3(params["w2b"]), col(params["b2b"]),
        fuse3(params["w2c"]), col(params["b2c"]),
        fuse3(params["w3"]),  col(params["b3"]),
    ]

    # --- batch-tile size: amortize per-step overhead, stay VMEM-friendly
    # (fits comfortably in v7x's smaller VMEM as well). ---
    tb = min(8, max(1, N // 2))
    while N % tb:
        tb -= 1
    per_n_bytes = 4 * HW * (C + 3 * F) * 4   # double-buffered in+out, + slack
    while tb > 1 and tb * per_n_bytes > (8 << 20):
        tb -= 1
        while N % tb:
            tb -= 1
    grid = (N // tb,)

    def full_spec(shape):
        nd = len(shape)
        return pl.BlockSpec(shape, lambda i, _nd=nd: (0,) * _nd)

    kernel = functools.partial(inception_kernel, n_per_step=tb, width=W,
                               n_filters=F)

    out = pl.pallas_call(
        kernel,
        out_shape=jax.ShapeDtypeStruct((N, 3 * F, HW), jnp.float32),
        grid_spec=pltpu.PrefetchScalarGridSpec(
            num_scalar_prefetch=0,
            grid=grid,
            in_specs=[pl.BlockSpec((tb, C, HW), lambda i: (i, 0, 0))]
                     + [full_spec(w.shape) for w in weight_args],
            out_specs=pl.BlockSpec((tb, 3 * F, HW), lambda i: (i, 0, 0)),
        ),
        compiler_params=pltpu.CompilerParams(
            dimension_semantics=("parallel",)),
    )(x_flat, *weight_args)

    # Free reshape back: (N, 3F, H*W) -> (N, 3F, H, W).
    return out.reshape(N, 3 * F, H, W)


# ----- pure-JAX reference (independent check, uses lax conv / reduce_window) -----
def ref_forward(x, params):
    lk = lambda v: jnp.where(v >= 0, v, ALPHA * v)

    def conv(inp, w, b, pad_h):
        y = jax.lax.conv_general_dilated(
            inp, w, window_strides=(1, 1),
            padding=[(pad_h, pad_h), (0, 0)],
            dimension_numbers=("NCHW", "OIHW", "NCHW"))
        return y + b[None, :, None, None]

    # kernel-layout -> torch OIHW layout
    t3 = lambda wk: jnp.transpose(wk, (2, 1, 0))[:, :, :, None]   # (3,Ci,Co)->(Co,Ci,3,1)
    t1 = lambda w1: jnp.transpose(w1)[:, :, None, None]           # (Ci,Co)->(Co,Ci,1,1)

    x1 = lk(conv(x, t1(params["w1a"]), params["b1a"], 0))
    x1 = lk(conv(x1, t3(params["w1b"]), params["b1b"], 1))

    x2 = lk(conv(x, t1(params["w2a"]), params["b2a"], 0))
    x2 = lk(conv(x2, t3(params["w2b"]), params["b2b"], 1))
    x2 = lk(conv(x2, t3(params["w2c"]), params["b2c"], 1))

    mp = jax.lax.reduce_window(
        x, -jnp.inf, jax.lax.max,
        window_dimensions=(1, 1, 3, 1), window_strides=(1, 1, 1, 1),
        padding=[(0, 0), (0, 0), (1, 1), (0, 0)])
    x3 = lk(conv(mp, t3(params["w3"]), params["b3"], 1))

    return jnp.concatenate([x1, x2, x3], axis=1)


if __name__ == "__main__":
    N, C, H, W, F = 2, 4, 16, 16, 8

    key = jax.random.PRNGKey(0)
    keys = jax.random.split(key, 13)

    def rnd(k, shape):
        return (0.1 * jax.random.normal(k, shape)).astype(jnp.float32)

    params = {
        "w1a": rnd(keys[0], (C, F)),     "b1a": rnd(keys[1], (F,)),
        "w1b": rnd(keys[2], (3, F, F)),  "b1b": rnd(keys[3], (F,)),
        "w2a": rnd(keys[4], (C, F)),     "b2a": rnd(keys[5], (F,)),
        "w2b": rnd(keys[6], (3, F, F)),  "b2b": rnd(keys[7], (F,)),
        "w2c": rnd(keys[8], (3, F, F)),  "b2c": rnd(keys[9], (F,)),
        "w3":  rnd(keys[10], (3, C, F)), "b3":  rnd(keys[11], (F,)),
    }
    x = rnd(keys[12], (N, C, H, W))

    out = jax.block_until_ready(inception_block_v2(x, params))
    ref = jax.block_until_ready(ref_forward(x, params))
    np.testing.assert_allclose(np.asarray(out), np.asarray(ref), rtol=1e-5, atol=1e-5)
    assert out.shape == (N, 3 * F, H, W)
    print("KERNEL_OK")
</pallas_src>

<mosaic_0001>
module attributes {stable_mosaic.version = 11 : i64} {
  func.func @inception_kernel(%arg0: i32, %arg1: memref<1x4x256xf32, #tpu.memory_space<vmem>>, %arg2: memref<16x4xf32, #tpu.memory_space<vmem>>, %arg3: memref<16x1xf32, #tpu.memory_space<vmem>>, %arg4: memref<8x24xf32, #tpu.memory_space<vmem>>, %arg5: memref<8x1xf32, #tpu.memory_space<vmem>>, %arg6: memref<8x24xf32, #tpu.memory_space<vmem>>, %arg7: memref<8x1xf32, #tpu.memory_space<vmem>>, %arg8: memref<8x24xf32, #tpu.memory_space<vmem>>, %arg9: memref<8x1xf32, #tpu.memory_space<vmem>>, %arg10: memref<8x12xf32, #tpu.memory_space<vmem>>, %arg11: memref<8x1xf32, #tpu.memory_space<vmem>>, %arg12: memref<1x24x256xf32, #tpu.memory_space<vmem>>) attributes {dimension_semantics = [#tpu.dimension_semantics<parallel>], iteration_bounds = array<i64: 2>, scalar_prefetch = 0 : i64, scratch_operands = 0 : i64, tpu.core_type = #tpu.core_type<tc>, window_params = [{transform_indices = @transform_0, window_bounds = array<i64: 1, 4, 256>}, {pipeline_mode = #tpu.pipeline_mode<synchronous>, transform_indices = @transform_1, window_bounds = array<i64: 16, 4>}, {pipeline_mode = #tpu.pipeline_mode<synchronous>, transform_indices = @transform_2, window_bounds = array<i64: 16, 1>}, {pipeline_mode = #tpu.pipeline_mode<synchronous>, transform_indices = @transform_3, window_bounds = array<i64: 8, 24>}, {pipeline_mode = #tpu.pipeline_mode<synchronous>, transform_indices = @transform_4, window_bounds = array<i64: 8, 1>}, {pipeline_mode = #tpu.pipeline_mode<synchronous>, transform_indices = @transform_5, window_bounds = array<i64: 8, 24>}, {pipeline_mode = #tpu.pipeline_mode<synchronous>, transform_indices = @transform_6, window_bounds = array<i64: 8, 1>}, {pipeline_mode = #tpu.pipeline_mode<synchronous>, transform_indices = @transform_7, window_bounds = array<i64: 8, 24>}, {pipeline_mode = #tpu.pipeline_mode<synchronous>, transform_indices = @transform_8, window_bounds = array<i64: 8, 1>}, {pipeline_mode = #tpu.pipeline_mode<synchronous>, transform_indices = @transform_9, window_bounds = array<i64: 8, 12>}, {pipeline_mode = #tpu.pipeline_mode<synchronous>, transform_indices = @transform_10, window_bounds = array<i64: 8, 1>}, {transform_indices = @transform_11, window_bounds = array<i64: 1, 24, 256>}]} {
    %c0 = arith.constant 0 : index
    %c0_0 = arith.constant 0 : index
    %c0_1 = arith.constant 0 : index
    %0 = vector.load %arg1[%c0, %c0_0, %c0_1] : memref<1x4x256xf32, #tpu.memory_space<vmem>>, vector<1x4x256xf32>
    %1 = vector.shape_cast %0 : vector<1x4x256xf32> to vector<4x256xf32>
    %c0_2 = arith.constant 0 : index
    %c0_3 = arith.constant 0 : index
    %2 = vector.load %arg2[%c0_2, %c0_3] : memref<16x4xf32, #tpu.memory_space<vmem>>, vector<16x4xf32>
    %cst = arith.constant dense<0.000000e+00> : vector<16x256xf32>
    %3 = tpu.matmul %2, %1, %cst {dimension_numbers = #tpu.dot_dimension_numbers<[1], [0], [0], [1], [0, 0, 1, 1], [], []>} : vector<16x4xf32>, vector<4x256xf32>, vector<16x256xf32> -> vector<16x256xf32>
    %c0_4 = arith.constant 0 : index
    %c0_5 = arith.constant 0 : index
    %4 = vector.load %arg3[%c0_4, %c0_5] : memref<16x1xf32, #tpu.memory_space<vmem>>, vector<16x1xf32>
    %5 = vector.broadcast %4 : vector<16x1xf32> to vector<16x256xf32>
    %6 = arith.addf %3, %5 : vector<16x256xf32>
    %cst_6 = arith.constant 0.000000e+00 : f32
    %7 = vector.broadcast %cst_6 : f32 to vector<16x256xf32>
    %8 = arith.cmpf oge, %6, %7 : vector<16x256xf32>
    %cst_7 = arith.constant 0.00999999977 : f32
    %9 = vector.broadcast %cst_7 : f32 to vector<16x256xf32>
    %10 = arith.mulf %9, %6 : vector<16x256xf32>
    %11 = arith.select %8, %6, %10 : vector<16x256xi1>, vector<16x256xf32>
    %12 = vector.extract_strided_slice %11 {offsets = [0, 0], sizes = [8, 256], strides = [1, 1]} : vector<16x256xf32> to vector<8x256xf32>
    %13 = vector.extract_strided_slice %11 {offsets = [8, 0], sizes = [8, 256], strides = [1, 1]} : vector<16x256xf32> to vector<8x256xf32>
    %cst_8 = arith.constant 0.000000e+00 : f32
    %14 = vector.broadcast %cst_8 : f32 to vector<8x16xf32>
    %15 = tpu.concatenate %14, %12, %14 in 1 : vector<8x16xf32>, vector<8x256xf32>, vector<8x16xf32> -> vector<8x288xf32>
    %16 = vector.extract_strided_slice %15 {offsets = [0, 0], sizes = [8, 256], strides = [1, 1]} : vector<8x288xf32> to vector<8x256xf32>
    %17 = vector.extract_strided_slice %15 {offsets = [0, 16], sizes = [8, 256], strides = [1, 1]} : vector<8x288xf32> to vector<8x256xf32>
    %18 = vector.extract_strided_slice %15 {offsets = [0, 32], sizes = [8, 256], strides = [1, 1]} : vector<8x288xf32> to vector<8x256xf32>
    %19 = tpu.concatenate %16, %17, %18 in 0 : vector<8x256xf32>, vector<8x256xf32>, vector<8x256xf32> -> vector<24x256xf32>
    %c0_9 = arith.constant 0 : index
    %c0_10 = arith.constant 0 : index
    %20 = vector.load %arg4[%c0_9, %c0_10] : memref<8x24xf32, #tpu.memory_space<vmem>>, vector<8x24xf32>
    %cst_11 = arith.constant dense<0.000000e+00> : vector<8x256xf32>
    %21 = tpu.matmul %20, %19, %cst_11 {dimension_numbers = #tpu.dot_dimension_numbers<[1], [0], [0], [1], [0, 0, 1, 1], [], []>} : vector<8x24xf32>, vector<24x256xf32>, vector<8x256xf32> -> vector<8x256xf32>
    %c0_12 = arith.constant 0 : index
    %c0_13 = arith.constant 0 : index
    %22 = vector.load %arg5[%c0_12, %c0_13] : memref<8x1xf32, #tpu.memory_space<vmem>>, vector<8x1xf32>
    %23 = vector.broadcast %22 : vector<8x1xf32> to vector<8x256xf32>
    %24 = arith.addf %21, %23 : vector<8x256xf32>
    %cst_14 = arith.constant 0.000000e+00 : f32
    %25 = vector.broadcast %cst_14 : f32 to vector<8x256xf32>
    %26 = arith.cmpf oge, %24, %25 : vector<8x256xf32>
    %cst_15 = arith.constant 0.00999999977 : f32
    %27 = vector.broadcast %cst_15 : f32 to vector<8x256xf32>
    %28 = arith.mulf %27, %24 : vector<8x256xf32>
    %29 = arith.select %26, %24, %28 : vector<8x256xi1>, vector<8x256xf32>
    %cst_16 = arith.constant 0.000000e+00 : f32
    %30 = vector.broadcast %cst_16 : f32 to vector<8x16xf32>
    %31 = tpu.concatenate %30, %13, %30 in 1 : vector<8x16xf32>, vector<8x256xf32>, vector<8x16xf32> -> vector<8x288xf32>
    %32 = vector.extract_strided_slice %31 {offsets = [0, 0], sizes = [8, 256], strides = [1, 1]} : vector<8x288xf32> to vector<8x256xf32>
    %33 = vector.extract_strided_slice %31 {offsets = [0, 16], sizes = [8, 256], strides = [1, 1]} : vector<8x288xf32> to vector<8x256xf32>
    %34 = vector.extract_strided_slice %31 {offsets = [0, 32], sizes = [8, 256], strides = [1, 1]} : vector<8x288xf32> to vector<8x256xf32>
    %35 = tpu.concatenate %32, %33, %34 in 0 : vector<8x256xf32>, vector<8x256xf32>, vector<8x256xf32> -> vector<24x256xf32>
    %c0_17 = arith.constant 0 : index
    %c0_18 = arith.constant 0 : index
    %36 = vector.load %arg6[%c0_17, %c0_18] : memref<8x24xf32, #tpu.memory_space<vmem>>, vector<8x24xf32>
    %cst_19 = arith.constant dense<0.000000e+00> : vector<8x256xf32>
    %37 = tpu.matmul %36, %35, %cst_19 {dimension_numbers = #tpu.dot_dimension_numbers<[1], [0], [0], [1], [0, 0, 1, 1], [], []>} : vector<8x24xf32>, vector<24x256xf32>, vector<8x256xf32> -> vector<8x256xf32>
    %c0_20 = arith.constant 0 : index
    %c0_21 = arith.constant 0 : index
    %38 = vector.load %arg7[%c0_20, %c0_21] : memref<8x1xf32, #tpu.memory_space<vmem>>, vector<8x1xf32>
    %39 = vector.broadcast %38 : vector<8x1xf32> to vector<8x256xf32>
    %40 = arith.addf %37, %39 : vector<8x256xf32>
    %cst_22 = arith.constant 0.000000e+00 : f32
    %41 = vector.broadcast %cst_22 : f32 to vector<8x256xf32>
    %42 = arith.cmpf oge, %40, %41 : vector<8x256xf32>
    %cst_23 = arith.constant 0.00999999977 : f32
    %43 = vector.broadcast %cst_23 : f32 to vector<8x256xf32>
    %44 = arith.mulf %43, %40 : vector<8x256xf32>
    %45 = arith.select %42, %40, %44 : vector<8x256xi1>, vector<8x256xf32>
    %cst_24 = arith.constant 0.000000e+00 : f32
    %46 = vector.broadcast %cst_24 : f32 to vector<8x16xf32>
    %47 = tpu.concatenate %46, %45, %46 in 1 : vector<8x16xf32>, vector<8x256xf32>, vector<8x16xf32> -> vector<8x288xf32>
    %48 = vector.extract_strided_slice %47 {offsets = [0, 0], sizes = [8, 256], strides = [1, 1]} : vector<8x288xf32> to vector<8x256xf32>
    %49 = vector.extract_strided_slice %47 {offsets = [0, 16], sizes = [8, 256], strides = [1, 1]} : vector<8x288xf32> to vector<8x256xf32>
    %50 = vector.extract_strided_slice %47 {offsets = [0, 32], sizes = [8, 256], strides = [1, 1]} : vector<8x288xf32> to vector<8x256xf32>
    %51 = tpu.concatenate %48, %49, %50 in 0 : vector<8x256xf32>, vector<8x256xf32>, vector<8x256xf32> -> vector<24x256xf32>
    %c0_25 = arith.constant 0 : index
    %c0_26 = arith.constant 0 : index
    %52 = vector.load %arg8[%c0_25, %c0_26] : memref<8x24xf32, #tpu.memory_space<vmem>>, vector<8x24xf32>
    %cst_27 = arith.constant dense<0.000000e+00> : vector<8x256xf32>
    %53 = tpu.matmul %52, %51, %cst_27 {dimension_numbers = #tpu.dot_dimension_numbers<[1], [0], [0], [1], [0, 0, 1, 1], [], []>} : vector<8x24xf32>, vector<24x256xf32>, vector<8x256xf32> -> vector<8x256xf32>
    %c0_28 = arith.constant 0 : index
    %c0_29 = arith.constant 0 : index
    %54 = vector.load %arg9[%c0_28, %c0_29] : memref<8x1xf32, #tpu.memory_space<vmem>>, vector<8x1xf32>
    %55 = vector.broadcast %54 : vector<8x1xf32> to vector<8x256xf32>
    %56 = arith.addf %53, %55 : vector<8x256xf32>
    %cst_30 = arith.constant 0.000000e+00 : f32
    %57 = vector.broadcast %cst_30 : f32 to vector<8x256xf32>
    %58 = arith.cmpf oge, %56, %57 : vector<8x256xf32>
    %cst_31 = arith.constant 0.00999999977 : f32
    %59 = vector.broadcast %cst_31 : f32 to vector<8x256xf32>
    %60 = arith.mulf %59, %56 : vector<8x256xf32>
    %61 = arith.select %58, %56, %60 : vector<8x256xi1>, vector<8x256xf32>
    %cst_32 = arith.constant 0xFF800000 : f32
    %62 = vector.broadcast %cst_32 : f32 to vector<4x16xf32>
    %63 = tpu.concatenate %62, %1, %62 in 1 : vector<4x16xf32>, vector<4x256xf32>, vector<4x16xf32> -> vector<4x288xf32>
    %64 = vector.extract_strided_slice %63 {offsets = [0, 0], sizes = [4, 256], strides = [1, 1]} : vector<4x288xf32> to vector<4x256xf32>
    %65 = vector.extract_strided_slice %63 {offsets = [0, 16], sizes = [4, 256], strides = [1, 1]} : vector<4x288xf32> to vector<4x256xf32>
    %66 = vector.extract_strided_slice %63 {offsets = [0, 32], sizes = [4, 256], strides = [1, 1]} : vector<4x288xf32> to vector<4x256xf32>
    %67 = arith.maximumf %64, %65 : vector<4x256xf32>
    %68 = arith.maximumf %67, %66 : vector<4x256xf32>
    %cst_33 = arith.constant 0.000000e+00 : f32
    %69 = vector.broadcast %cst_33 : f32 to vector<4x16xf32>
    %70 = tpu.concatenate %69, %68, %69 in 1 : vector<4x16xf32>, vector<4x256xf32>, vector<4x16xf32> -> vector<4x288xf32>
    %71 = vector.extract_strided_slice %70 {offsets = [0, 0], sizes = [4, 256], strides = [1, 1]} : vector<4x288xf32> to vector<4x256xf32>
    %72 = vector.extract_strided_slice %70 {offsets = [0, 16], sizes = [4, 256], strides = [1, 1]} : vector<4x288xf32> to vector<4x256xf32>
    %73 = vector.extract_strided_slice %70 {offsets = [0, 32], sizes = [4, 256], strides = [1, 1]} : vector<4x288xf32> to vector<4x256xf32>
    %74 = tpu.concatenate %71, %72, %73 in 0 : vector<4x256xf32>, vector<4x256xf32>, vector<4x256xf32> -> vector<12x256xf32>
    %c0_34 = arith.constant 0 : index
    %c0_35 = arith.constant 0 : index
    %75 = vector.load %arg10[%c0_34, %c0_35] : memref<8x12xf32, #tpu.memory_space<vmem>>, vector<8x12xf32>
    %cst_36 = arith.constant dense<0.000000e+00> : vector<8x256xf32>
    %76 = tpu.matmul %75, %74, %cst_36 {dimension_numbers = #tpu.dot_dimension_numbers<[1], [0], [0], [1], [0, 0, 1, 1], [], []>} : vector<8x12xf32>, vector<12x256xf32>, vector<8x256xf32> -> vector<8x256xf32>
    %c0_37 = arith.constant 0 : index
    %c0_38 = arith.constant 0 : index
    %77 = vector.load %arg11[%c0_37, %c0_38] : memref<8x1xf32, #tpu.memory_space<vmem>>, vector<8x1xf32>
    %78 = vector.broadcast %77 : vector<8x1xf32> to vector<8x256xf32>
    %79 = arith.addf %76, %78 : vector<8x256xf32>
    %cst_39 = arith.constant 0.000000e+00 : f32
    %80 = vector.broadcast %cst_39 : f32 to vector<8x256xf32>
    %81 = arith.cmpf oge, %79, %80 : vector<8x256xf32>
    %cst_40 = arith.constant 0.00999999977 : f32
    %82 = vector.broadcast %cst_40 : f32 to vector<8x256xf32>
    %83 = arith.mulf %82, %79 : vector<8x256xf32>
    %84 = arith.select %81, %79, %83 : vector<8x256xi1>, vector<8x256xf32>
    %c0_41 = arith.constant 0 : index
    %c0_42 = arith.constant 0 : index
    %c0_43 = arith.constant 0 : index
    %85 = vector.load %arg12[%c0_41, %c0_42, %c0_43] : memref<1x24x256xf32, #tpu.memory_space<vmem>>, vector<1x8x256xf32>
    %86 = vector.shape_cast %85 : vector<1x8x256xf32> to vector<8x256xf32>
    %87 = vector.shape_cast %29 : vector<8x256xf32> to vector<1x8x256xf32>
    tpu.vector_store %arg12[%c0_41, %c0_42, %c0_43], %87 {strides = array<i32>} : memref<1x24x256xf32, #tpu.memory_space<vmem>>, vector<1x8x256xf32>,
    %c0_44 = arith.constant 0 : index
    %c8 = arith.constant 8 : index
    %c0_45 = arith.constant 0 : index
    %88 = vector.load %arg12[%c0_44, %c8, %c0_45] : memref<1x24x256xf32, #tpu.memory_space<vmem>>, vector<1x8x256xf32>
    %89 = vector.shape_cast %88 : vector<1x8x256xf32> to vector<8x256xf32>
    %90 = vector.shape_cast %61 : vector<8x256xf32> to vector<1x8x256xf32>
    tpu.vector_store %arg12[%c0_44, %c8, %c0_45], %90 {strides = array<i32>} : memref<1x24x256xf32, #tpu.memory_space<vmem>>, vector<1x8x256xf32>,
    %c0_46 = arith.constant 0 : index
    %c16 = arith.constant 16 : index
    %c0_47 = arith.constant 0 : index
    %91 = vector.load %arg12[%c0_46, %c16, %c0_47] : memref<1x24x256xf32, #tpu.memory_space<vmem>>, vector<1x8x256xf32>
    %92 = vector.shape_cast %91 : vector<1x8x256xf32> to vector<8x256xf32>
    %93 = vector.shape_cast %84 : vector<8x256xf32> to vector<1x8x256xf32>
    tpu.vector_store %arg12[%c0_46, %c16, %c0_47], %93 {strides = array<i32>} : memref<1x24x256xf32, #tpu.memory_space<vmem>>, vector<1x8x256xf32>,
    return
  }
  func.func @transform_0(%arg0: i32) -> (i32, i32, i32) {
    %c0_i32 = arith.constant 0 : i32
    %c0_i32_0 = arith.constant 0 : i32
    %c0_i32_1 = arith.constant 0 : i32
    return %arg0, %c0_i32, %c0_i32_0 : i32, i32, i32
  }
  func.func @transform_1(%arg0: i32) -> (i32, i32) {
    %c0_i32 = arith.constant 0 : i32
    %c0_i32_0 = arith.constant 0 : i32
    %c0_i32_1 = arith.constant 0 : i32
    return %c0_i32, %c0_i32_0 : i32, i32
  }
  func.func @transform_2(%arg0: i32) -> (i32, i32) {
    %c0_i32 = arith.constant 0 : i32
    %c0_i32_0 = arith.constant 0 : i32
    %c0_i32_1 = arith.constant 0 : i32
    return %c0_i32, %c0_i32_0 : i32, i32
  }
  func.func @transform_3(%arg0: i32) -> (i32, i32) {
    %c0_i32 = arith.constant 0 : i32
    %c0_i32_0 = arith.constant 0 : i32
    %c0_i32_1 = arith.constant 0 : i32
    return %c0_i32, %c0_i32_0 : i32, i32
  }
  func.func @transform_4(%arg0: i32) -> (i32, i32) {
    %c0_i32 = arith.constant 0 : i32
    %c0_i32_0 = arith.constant 0 : i32
    %c0_i32_1 = arith.constant 0 : i32
    return %c0_i32, %c0_i32_0 : i32, i32
  }
  func.func @transform_5(%arg0: i32) -> (i32, i32) {
    %c0_i32 = arith.constant 0 : i32
    %c0_i32_0 = arith.constant 0 : i32
    %c0_i32_1 = arith.constant 0 : i32
    return %c0_i32, %c0_i32_0 : i32, i32
  }
  func.func @transform_6(%arg0: i32) -> (i32, i32) {
    %c0_i32 = arith.constant 0 : i32
    %c0_i32_0 = arith.constant 0 : i32
    %c0_i32_1 = arith.constant 0 : i32
    return %c0_i32, %c0_i32_0 : i32, i32
  }
  func.func @transform_7(%arg0: i32) -> (i32, i32) {
    %c0_i32 = arith.constant 0 : i32
    %c0_i32_0 = arith.constant 0 : i32
    %c0_i32_1 = arith.constant 0 : i32
    return %c0_i32, %c0_i32_0 : i32, i32
  }
  func.func @transform_8(%arg0: i32) -> (i32, i32) {
    %c0_i32 = arith.constant 0 : i32
    %c0_i32_0 = arith.constant 0 : i32
    %c0_i32_1 = arith.constant 0 : i32
    return %c0_i32, %c0_i32_0 : i32, i32
  }
  func.func @transform_9(%arg0: i32) -> (i32, i32) {
    %c0_i32 = arith.constant 0 : i32
    %c0_i32_0 = arith.constant 0 : i32
    %c0_i32_1 = arith.constant 0 : i32
    return %c0_i32, %c0_i32_0 : i32, i32
  }
  func.func @transform_10(%arg0: i32) -> (i32, i32) {
    %c0_i32 = arith.constant 0 : i32
    %c0_i32_0 = arith.constant 0 : i32
    %c0_i32_1 = arith.constant 0 : i32
    return %c0_i32, %c0_i32_0 : i32, i32
  }
  func.func @transform_11(%arg0: i32) -> (i32, i32, i32) {
    %c0_i32 = arith.constant 0 : i32
    %c0_i32_0 = arith.constant 0 : i32
    %c0_i32_1 = arith.constant 0 : i32
    return %arg0, %c0_i32, %c0_i32_0 : i32, i32, i32
  }
}

</mosaic_0001>

<bundles_post_ra>
// kernel: tpu_custom_call.1
= control target key start
LH: loop header
LB: loop body
LE: loop exit
PB: predicated region body
PF: predicated region fallthrough
CT: control target
= control target key end

     0   :  { %s1591_s0 = inlined_call_operand.vmem [shape: f32[2,4,256], index: 0, kind: input, shape index: {}]   ;;  %s1592_s1 = inlined_call_operand.vmem [shape: f32[16,4], index: 1, kind: input, shape index: {}]   ;;  %s1593_s2 = inlined_call_operand.vmem [shape: f32[16,1], index: 2, kind: input, shape index: {}]   ;;  %s1594_s3 = inlined_call_operand.vmem [shape: f32[8,24], index: 3, kind: input, shape index: {}]   ;;  %s1595_s4 = inlined_call_operand.vmem [shape: f32[8,1], index: 4, kind: input, shape index: {}]   ;;  %s1596_s5 = inlined_call_operand.vmem [shape: f32[8,24], index: 5, kind: input, shape index: {}]   ;;  %s1597_s6 = inlined_call_operand.vmem [shape: f32[8,1], index: 6, kind: input, shape index: {}]   ;;  %s1598_s7 = inlined_call_operand.vmem [shape: f32[8,24], index: 7, kind: input, shape index: {}]   ;;  %s1599_s8 = inlined_call_operand.vmem [shape: f32[8,1], index: 8, kind: input, shape index: {}]   ;;  %s1600_s9 = inlined_call_operand.vmem [shape: f32[8,12], index: 9, kind: input, shape index: {}]   ;;  %s1601_s10 = inlined_call_operand.vmem [shape: f32[8,1], index: 10, kind: input, shape index: {}]   ;;  %s1602_s11 = inlined_call_operand.hbm [shape: f32[2,24,256], index: 11, kind: output, shape index: {}]  }
   0x1   :  { %1604 = sst [smem:[#allocation5_spill]] %s1591_s0 }
   0x2   :  { %16 = vsyncpa [#allocation3], 0 }
   0x3   :  { %18 = vsyncpa [#allocation3 + $0x1], 0  ;;  %s1322_s17 = smov 0   ;;  %s1324_s18 = smov 0  }
   0x4   :  { %s1326_s19 = smov 0   ;;  %s1328_s20 = smov 0  }
   0x5 LB: > { %s1343_s21 = sadd.s32 4294967295, %s1253_s20   ;;  %s1117_s22 = sadd.s32 4294967294, %s1253_s20   ;;  %s1253_s20 = sphi %s1328_s20, %s1614_s20   ;;  %s1249_s19 = sphi %s1326_s19, %s1613_s19   ;;  %s1245_s18 = sphi %s1324_s18, %s1612_s18   ;;  %s1241_s17 = sphi %s1322_s17, %s1611_s17  }
   0x6   : > { %s1347_s23 = sadd.s32 1, %s1253_s20   ;;  %s267_s24 = sadd.s32 1, %s1249_s19 }
   0x7   : > { %s264_s25 = ssub.s32 %s1253_s20, %s1347_s23  ;;  %p277_p0 = scmp.ne.s32.totalorder %s1249_s19, %s1245_s18 }
   0x8   : > { %p265_p1 = scmp.eq.s32.totalorder %s264_s25, 0  ;;  %p278_p2 = scmp.eq.s32.totalorder %s1343_s21, 1 }
   0x9   : > { %p283_p3 = scmp.ne.s32.totalorder %s1245_s18, %s1241_s17  ;;  %p284_p4 = scmp.eq.s32.totalorder %s1117_s22, 1 }
   0xa   : > { %s1358_s26 = scalar_select %p265_p1, %s1249_s19, %s267_s24  }
   0xb   : > { %p1360_p5 = por %p278_p2, %p277_p0  ;;  %p1364_p6 = por %p284_p4, %p283_p3 }
   0xc   : > { %p1120_p7 = scmp.ge.s32.totalorder %s1253_s20, 1  ;;  %p340_p8 = scmp.lt.s32.totalorder %s1253_s20, 3 }
   0xe   : > { %p341_p9 = pnand %p1120_p7, %p340_p8 }
   0xf   : > { %p380_p10 = scmp.lt.s32.totalorder (!%p341_p9), %s1343_s21, 1  ;;  %s1607_s0 = sld [smem:[#allocation5_spill]] (!%p341_p9) }
  0x10   : > { %344 = sbr.rel (%p341_p9) target bundleno = 1151 (0x47f), region = 64  ;;  %s1603_s30 = smov (!%p341_p9), 16  }
  0x11   : > { %s1144_s25 = smul.u32 (!%p341_p9), 768, %s1343_s21 }
  0x15   : > { %v1255_v0 = vmov 0.0   ;;  %v389_v1 = vld [vmem:[%s1593_s2 + $0x8] sm:$0xff]  ;;  %s381_s12 = scalar_select %p380_p10, %s1343_s21, 1  ;;  %v1256_v2 = vmov 0   ;;  %vm409_vm0 = vcmask 1043456   ;;  %v386_v5 = vld [vmem:[%s1592_s1] sm:$0xff] }
  0x16   : > { %478 = vmatprep.mubr.f32.mxu0 %v1255_v0  ;;  %615 = vmatprep.mubr.f32.mxu1 %v1255_v0  ;;  %vm402_vm1 = vcmask 31744   ;;  %v387_v6 = vld [vmem:[%s1592_s1 + $0x8] sm:$0xff]  ;;  %vm509_vm4 = vcmask 130048   ;;  %v388_v23 = vld [vmem:[%s1593_s2] sm:$0xff]  ;;  %vm535_vm5 = vcmask 785408   ;;  %vm524_vm6 = vcmask 916480  }
  0x17   : > { %1190 = vset.pattern.permute.xlu0 %v1256_v2  ;;  %1191 = vset.pattern.permute.xlu1 %v1256_v2  ;;  %s1142_s13 = sshll.u32 %s381_s12, 3  ;;  %s1258_s12 = smov 96   ;;  %v663_v24 = vld [vmem:[%s1597_s6] sm:$0xff]  ;;  %vm1418_vm7 = vmneg %vm509_vm4  ;;  %vm547_vm8 = vcmask 195584   ;;  %vm950_vm13 = vcmask 97280  }
  0x18   : > { %397 = vperm.xlu0 %1190, %v389_v1   ;;  %s384_s16 = scalar_lea.vmem %s1607_s0, %s1142_s13  ;;  %s1259_s13 = smov 112   ;;  %v662_v37 = vld [vmem:[%s1596_s5] sm:$0xff] }
  0x19   : > { %v385_v3 = vld [vmem:[%s384_s16] sm:$0xff]  ;;  %s377_s16 = sand.u32 1, %s1245_s18  }
  0x1a   : > { %v401_v4 = vcombine.high %v385_v3, %v385_v3  ;;  %s1143_s22 = smul.u32 48, %s377_s16  ;;  %s1550_s14 = scalar_lea.sflag [#allocation3], %s377_s16 }
  0x1c   : > { %1123 = vmatprep.subr.msk.mxu0 %vm409_vm0, %v401_v4  ;;  %s1531_s24 = scalar_lea.vmem [#allocation2], %s1143_s22  ;;  %s1260_s22 = smov [#allocation2]  }
  0x1d   : > { %1124 = vmatpush1.msk.msra.mxu0 %vm409_vm0, %v385_v3  ;;  %s1055_s29 = sshll.u32 %s1531_s24, 4  ;;  %s1545_s29 = int_to_ptr.vmem [resolvable:$true] %s1055_s29 }
  0x1e   : > { %1125 = vmatmul.mubr.msk.f32.vlgmr.msra.gmra.mxu0 %vm402_vm1, %v386_v5  ;;  %s1193_s15 = scalar_lea.vmem %s1545_s29, 768 }
  0x1f   : > { %484 = vmatprep.mubr.f32.mxu0 %v1255_v0  ;;  %p1194_p11 = scmp.ne.s32.totalorder %s1545_s29, %s1193_s15 }
  0x21   : > { %p1195_p12 = pnand %p1194_p11, %p1360_p5 }
  0x22   : > { %1126 = vmatmul.mubr.msk.f32.gmra.mxu0 %vm402_vm1, %v387_v6 }
  0x23   : > { %736 = vmatprep.mubr.f32.mxu0 %v1255_v0  ;;  %p1196_p13 = pneg %p1195_p12 }
  0x93   : > { %v398_v9 = vpop.permute.xlu0 %397 }
  0xde   : > { %v1390_v7 = vpop.f32.mrf.mxu0 }
  0xe0   : > { %v1392_v8 = vpop.f32.mrf.mxu0 }
  0xe2   : > { %v486_v10 = vpop.f32.mrf.mxu0 }
  0xe3   : > { %v487_v11 = vadd.f32 %v486_v10, %v398_v9 }
  0xe4   : > { %v488_v12 = vpop.f32.mrf.mxu0 }
  0xe5   : > { %v497_v13 = vmul.f32 0.01, %v487_v11  ;;  %v489_v14 = vadd.f32 %v488_v12, %v398_v9  ;;  %vm493_vm2 = vcmp.ge.f32.partialorder %v487_v11, 0.0 }
  0xe7   : > { %v501_v15 = vsel %vm493_vm2, %v487_v11, %v497_v13  ;;  %vm494_vm3 = vcmp.ge.f32.partialorder %v489_v14, 0.0  ;;  %v498_v16 = vmul.f32 0.01, %v489_v14 }
  0xe8   : > { %630 = vrot.lane.b32.xlu0 %v501_v15, %s1603_s30 }
  0xe9   : > { %v502_v17 = vsel %vm494_vm3, %v489_v14, %v498_v16 }
  0xea   : > { %632 = vrot.lane.b32.xlu1 %v502_v17, %s1603_s30 }
 0x15a   : > { %v631_v18 = vpop.permute.xlu0 %630 }
 0x15b   : > { %v638_v19 = vsel %vm509_vm4, 0.0, %v631_v18 }
 0x15c   : > { %v633_v20 = vpop.permute.xlu1 %632  ;;  %652 = vrot.lane.b32.xlu1 %v638_v19, %s1258_s12 }
 0x15d   : > { %v639_v21 = vsel %vm509_vm4, %v633_v20, 0.0  ;;  %v634_v22 = vsel %vm509_vm4, %v631_v18, %v633_v20 }
 0x15e   : > { %656 = vrot.lane.b32.xlu0 %v639_v21, %s1258_s12 }
 0x160   : > { %654 = vrot.lane.b32.xlu1 %v634_v22, %s1258_s12 }
 0x162   : > { %644 = vrot.lane.b32.xlu0 %v634_v22, %s1259_s13 }
 0x164   : > { %646 = vrot.lane.b32.xlu1 %v639_v21, %s1259_s13 }
 0x166   : > { %642 = vrot.lane.b32.xlu0 %v638_v19, %s1259_s13 }
 0x168   : > { %870 = vrot.lane.b32.xlu1 %v385_v3, %s1603_s30 }
 0x16a   : > { %872 = vrot.lane.b32.xlu0 %v401_v4, %s1603_s30 }
 0x16c   : > { %392 = vperm.xlu1 %1191, %v388_v23  }
 0x16e   : > { %666 = vperm.xlu0 %1190, %v663_v24  }
 0x1ce   : > { %v653_v25 = vpop.permute.xlu1 %652 }
 0x1d0   : > { %v657_v26 = vpop.permute.xlu0 %656 }
 0x1d2   : > { %v655_v27 = vpop.permute.xlu1 %654 }
 0x1d3   : > { %v658_v28 = vsel %vm535_vm5, %v653_v25, %v655_v27  ;;  %v659_v29 = vsel %vm535_vm5, %v655_v27, %v657_v26 }
 0x1d4   : > { %698 = vmatprep.subr.mxu0 %v659_v29  ;;  %v645_v30 = vpop.permute.xlu0 %644 }
 0x1d5   : > { %699 = vmatpush1.msra.mxu0 %v658_v28 }
 0x1d6   : > { %v647_v31 = vpop.permute.xlu1 %646 }
 0x1d7   : > { %v649_v32 = vsel %vm524_vm6, %v645_v30, %v647_v31 }
 0x1d8   : > { %700 = vmatprep.subr.mxu0 %v649_v32  ;;  %v643_v33 = vpop.permute.xlu0 %642 }
 0x1d9   : > { %v648_v34 = vsel %vm524_vm6, %v643_v33, %v645_v30 }
 0x1da   : > { %v871_v36 = vpop.permute.xlu1 %870  ;;  %701 = vmatpush1.msra.mxu0 %v648_v34 }
 0x1db   : > { %702 = vmatprep.subr.mxu0 %v634_v22  ;;  %v878_v38 = vsel %vm509_vm4, -inf, %v871_v36 }
 0x1dc   : > { %882 = vrot.lane.b32.xlu1 %v878_v38, %s1259_s13  ;;  %1131 = vmatpush1.msk.msra.mxu0 %vm1418_vm7, %v631_v18  ;;  %v873_v39 = vpop.permute.xlu0 %872 }
 0x1dd   : > { %1132 = vmatmul.mubr.msk.f32.vlgmr.msra.gmra.mxu0 %vm547_vm8, %v662_v37  ;;  %v874_v40 = vsel %vm509_vm4, %v871_v36, %v873_v39  ;;  %v879_v41 = vsel %vm509_vm4, %v873_v39, -inf  ;;  %v540_v36 = vld [vmem:[%s1594_s3] sm:$0xff] }
 0x1de   : > { %884 = vrot.lane.b32.xlu0 %v874_v40, %s1259_s13  ;;  %1022 = vmatprep.mubr.f32.mxu0 %v1255_v0  ;;  %v784_v39 = vld [vmem:[%s1599_s8] sm:$0xff] }
 0x1e0   : > { %886 = vrot.lane.b32.xlu1 %v879_v41, %s1259_s13 }
 0x1e2   : > { %894 = vrot.lane.b32.xlu0 %v878_v38, %s1258_s12 }
 0x1e4   : > { %896 = vrot.lane.b32.xlu1 %v874_v40, %s1258_s12 }
 0x1e6   : > { %898 = vrot.lane.b32.xlu0 %v879_v41, %s1258_s12  ;;  %v944_v41 = vld [vmem:[%s1601_s10] sm:$0xff] }
 0x1e7   : > { %v393_v42 = vpop.permute.xlu1 %392 }
 0x1e8   : > { %v481_v43 = vadd.f32 %v1390_v7, %v393_v42  ;;  %v483_v44 = vadd.f32 %v1392_v8, %v393_v42 }
 0x1e9   : > { %v667_v49 = vpop.permute.xlu0 %666 }
 0x1ea   : > { %vm491_vm9 = vcmp.ge.f32.partialorder %v481_v43, 0.0  ;;  %v495_v45 = vmul.f32 0.01, %v481_v43  ;;  %vm492_vm10 = vcmp.ge.f32.partialorder %v483_v44, 0.0  ;;  %v496_v46 = vmul.f32 0.01, %v483_v44 }
 0x1ec   : > { %v499_v47 = vsel %vm491_vm9, %v481_v43, %v495_v45  ;;  %v500_v48 = vsel %vm492_vm10, %v483_v44, %v496_v46 }
 0x1ed   : > { %505 = vrot.lane.b32.xlu1 %v499_v47, %s1603_s30  ;;  %507 = vrot.lane.b32.xlu0 %v500_v48, %s1603_s30 }
 0x24e   : > { %v883_v50 = vpop.permute.xlu1 %882 }
 0x250   : > { %v885_v51 = vpop.permute.xlu0 %884 }
 0x251   : > { %v888_v58 = vsel %vm524_vm6, %v883_v50, %v885_v51 }
 0x252   : > { %v887_v52 = vpop.permute.xlu1 %886  ;;  %v892_v3 = vmax.f32 %v878_v38, %v888_v58  ;;  %v783_v58 = vld [vmem:[%s1598_s7] sm:$0xff] }
 0x253   : > { %v889_v61 = vsel %vm524_vm6, %v885_v51, %v887_v52 }
 0x254   : > { %v895_v53 = vpop.permute.xlu0 %894  ;;  %v893_v6 = vmax.f32 %v874_v40, %v889_v61  ;;  %v541_v40 = vld [vmem:[%s1595_s4] sm:$0xff] }
 0x256   : > { %v897_v56 = vpop.permute.xlu1 %896 }
 0x257   : > { %v900_v63 = vsel %vm535_vm5, %v895_v53, %v897_v56 }
 0x258   : > { %v899_v62 = vpop.permute.xlu0 %898  ;;  %v904_v7 = vmax.f32 %v892_v3, %v900_v63 }
 0x259   : > { %v901_v4 = vsel %vm535_vm5, %v897_v56, %v899_v62 }
 0x25a   : > { %v905_v8 = vmax.f32 %v893_v6, %v901_v4 }
 0x25f   : > { %v506_v9 = vpop.permute.xlu1 %505  ;;  %v508_v10 = vpop.permute.xlu0 %507 }
 0x260   : > { %v510_v11 = vsel %vm509_vm4, %v506_v9, %v508_v10  ;;  %v515_v12 = vsel %vm509_vm4, %v508_v10, 0.0  ;;  %v514_v13 = vsel %vm509_vm4, 0.0, %v506_v9 }
 0x29d   : > { %v738_v54 = vpop.f32.mrf.mxu0 }
 0x29e   : > { %v739_v55 = vadd.f32 %v738_v54, %v667_v49 }
 0x29f   : > { %v740_v57 = vpop.f32.mrf.mxu0 }
 0x2a0   : > { %v745_v59 = vmul.f32 0.01, %v739_v55  ;;  %v741_v60 = vadd.f32 %v740_v57, %v667_v49  ;;  %vm743_vm11 = vcmp.ge.f32.partialorder %v739_v55, 0.0 }
 0x2a2   : > { %v746_v1 = vmul.f32 0.01, %v741_v60  ;;  %v747_v2 = vsel %vm743_vm11, %v739_v55, %v745_v59  ;;  %vm744_vm12 = vcmp.ge.f32.partialorder %v741_v60, 0.0 }
 0x2a3   : > { %751 = vrot.lane.b32.xlu1 %v747_v2, %s1603_s30 }
 0x2a4   : > { %v748_v5 = vsel %vm744_vm12, %v741_v60, %v746_v1  ;;  %v943_v1 = vld [vmem:[%s1600_s9] sm:$0xff] }
 0x2a5   : > { %753 = vrot.lane.b32.xlu0 %v748_v5, %s1603_s30 }
 0x2a7   : > { %908 = vrot.lane.b32.xlu1 %v904_v7, %s1603_s30 }
 0x2a9   : > { %910 = vrot.lane.b32.xlu0 %v905_v8, %s1603_s30 }
 0x2ab   : > { %531 = vrot.lane.b32.xlu1 %v510_v11, %s1258_s12 }
 0x2ad   : > { %533 = vrot.lane.b32.xlu0 %v515_v12, %s1258_s12 }
 0x2af   : > { %529 = vrot.lane.b32.xlu1 %v514_v13, %s1258_s12 }
 0x2b1   : > { %520 = vrot.lane.b32.xlu0 %v510_v11, %s1259_s13 }
 0x2b3   : > { %522 = vrot.lane.b32.xlu1 %v515_v12, %s1259_s13 }
 0x2b5   : > { %518 = vrot.lane.b32.xlu0 %v514_v13, %s1259_s13 }
 0x315   : > { %v1459_v14 = vpop.permute.xlu1 %751 }
 0x316   : > { %v759_v28 = vsel %vm509_vm4, 0.0, %v1459_v14 }
 0x317   : > { %v754_v15 = vpop.permute.xlu0 %753 }
 0x318   : > { %v760_v32 = vsel %vm509_vm4, %v754_v15, 0.0  ;;  %v755_v33 = vsel %vm509_vm4, %v1459_v14, %v754_v15 }
 0x319   : > { %v909_v16 = vpop.permute.xlu1 %908 }
 0x31a   : > { %v916_v37 = vsel %vm509_vm4, 0.0, %v909_v16 }
 0x31b   : > { %v911_v17 = vpop.permute.xlu0 %910  ;;  %v920_v38 = vrot.slane %v916_v37, 4 }
 0x31c   : > { %v917_v18 = vsel %vm509_vm4, %v911_v17, 0.0  ;;  %v1463_v19 = vsel %vm509_vm4, %v909_v16, %v911_v17 }
 0x31d   : > { %v532_v20 = vpop.permute.xlu1 %531  ;;  %937 = vrot.lane.b32.xlu1 %v917_v18, %s1258_s12  ;;  %935 = vrot.lane.b32.xlu0 %v1463_v19, %s1258_s12  ;;  %v922_v21 = vrot.slane %v917_v18, 4  ;;  %v921_v23 = vrot.slane %v1463_v19, 4 }
 0x31f   : > { %v534_v22 = vpop.permute.xlu0 %533 }
 0x320   : > { %v537_v24 = vsel %vm535_vm5, %v532_v20, %v534_v22 }
 0x321   : > { %v530_v25 = vpop.permute.xlu1 %529  ;;  %927 = vrot.lane.b32.xlu0 %v922_v21, %s1259_s13  ;;  %925 = vrot.lane.b32.xlu1 %v921_v23, %s1259_s13 }
 0x322   : > { %577 = vmatprep.subr.mxu1 %v537_v24  ;;  %v536_v26 = vsel %vm535_vm5, %v530_v25, %v532_v20 }
 0x323   : > { %578 = vmatpush1.msra.mxu1 %v536_v26  ;;  %v521_v27 = vpop.permute.xlu0 %520 }
 0x325   : > { %v523_v29 = vpop.permute.xlu1 %522  ;;  %763 = vrot.lane.b32.xlu0 %v759_v28, %s1259_s13  ;;  %773 = vrot.lane.b32.xlu1 %v759_v28, %s1258_s12 }
 0x326   : > { %v526_v30 = vsel %vm524_vm6, %v521_v27, %v523_v29 }
 0x327   : > { %579 = vmatprep.subr.mxu1 %v526_v30  ;;  %v519_v31 = vpop.permute.xlu0 %518 }
 0x328   : > { %v525_v34 = vsel %vm524_vm6, %v519_v31, %v521_v27 }
 0x329   : > { %777 = vrot.lane.b32.xlu0 %v760_v32, %s1258_s12  ;;  %775 = vrot.lane.b32.xlu1 %v755_v33, %s1258_s12 }
 0x32a   : > { %580 = vmatpush1.msra.mxu1 %v525_v34 }
 0x32b   : > { %581 = vmatprep.subr.mxu1 %v510_v11 }
 0x32c   : > { %1128 = vmatpush1.msk.msra.mxu1 %vm1418_vm7, %v506_v9 }
 0x32d   : > { %1129 = vmatmul.mubr.msk.f32.vlgmr.msra.gmra.mxu1 %vm547_vm8, %v540_v36  ;;  %765 = vrot.lane.b32.xlu0 %v755_v33, %s1259_s13 }
 0x32e   : > { %767 = vrot.lane.b32.xlu1 %v760_v32, %s1259_s13  ;;  %857 = vmatprep.mubr.f32.mxu1 %v1255_v0 }
 0x331   : > { %923 = vrot.lane.b32.xlu0 %v920_v38, %s1259_s13  ;;  %s1542_s13 = scalar_lea.hbm %s1602_s11, %s1144_s25 }
 0x332   : > { %933 = vrot.lane.b32.xlu1 %v916_v37, %s1258_s12  ;;  %s1197_s12 = sshll.u32 %s1260_s22, 4  ;;  %s1198_s12 = int_to_ptr.vmem [resolvable:$false] %s1197_s12 }
 0x333   : > { %s1199_s25 = scalar_lea.vmem %s1198_s12, 1536  ;;  %p1200_p0 = scmp.lt.s32.totalorder %s1545_s29, %s1198_s12 }
 0x334   : > { %p1201_p1 = scmp.lt.s32.totalorder %s1199_s25, %s1193_s15 }
 0x335   : > { %787 = vperm.xlu0 %1190, %v784_v39  }
 0x336   : > { %544 = vperm.xlu1 %1191, %v541_v40   ;;  %p1202_p2 = por %p1201_p1, %p1200_p0 }
 0x338   : > { %p1203_p3 = pnand %p1202_p2, %p1196_p13 }
 0x33a   : > { %947 = vperm.xlu1 %1191, %v944_v41  }
 0x38f   : > { %v938_v0 = vpop.permute.xlu1 %937  ;;  %v936_v42 = vpop.permute.xlu0 %935 }
 0x390   : > { %v940_v43 = vsel %vm535_vm5, %v936_v42, %v938_v0 }
 0x391   : > { %1136 = vmatprep.subr.msk.mxu0 %vm409_vm0, %v940_v43 }
 0x393   : > { %v926_v44 = vpop.permute.xlu1 %925  ;;  %v928_v45 = vpop.permute.xlu0 %927 }
 0x394   : > { %v930_v56 = vsel %vm524_vm6, %v926_v44, %v928_v45 }
 0x395   : > { %v942_v63 = vsel %vm409_vm0, %v1463_v19, %v930_v56 }
 0x397   : > { %v774_v46 = vpop.permute.xlu1 %773  ;;  %v764_v47 = vpop.permute.xlu0 %763 }
 0x39b   : > { %v776_v48 = vpop.permute.xlu1 %775  ;;  %v778_v49 = vpop.permute.xlu0 %777 }
 0x39c   : > { %v779_v50 = vsel %vm535_vm5, %v774_v46, %v776_v48  ;;  %v780_v51 = vsel %vm535_vm5, %v776_v48, %v778_v49 }
 0x39d   : > { %819 = vmatprep.subr.mxu1 %v780_v51 }
 0x39e   : > { %820 = vmatpush1.msra.mxu1 %v779_v50 }
 0x39f   : > { %v766_v52 = vpop.permute.xlu0 %765 }
 0x3a0   : > { %v768_v53 = vpop.permute.xlu1 %767  ;;  %v769_v54 = vsel %vm524_vm6, %v764_v47, %v766_v52 }
 0x3a1   : > { %v770_v55 = vsel %vm524_vm6, %v766_v52, %v768_v53 }
 0x3a2   : > { %821 = vmatprep.subr.mxu1 %v770_v55 }
 0x3a3   : > { %822 = vmatpush1.msra.mxu1 %v769_v54  ;;  %v924_v57 = vpop.permute.xlu0 %923 }
 0x3a4   : > { %v934_v59 = vpop.permute.xlu1 %933  ;;  %823 = vmatprep.subr.mxu1 %v755_v33  ;;  %v929_v60 = vsel %vm524_vm6, %v924_v57, %v926_v44 }
 0x3a5   : > { %v939_v61 = vsel %vm535_vm5, %v934_v59, %v936_v42  ;;  %1134 = vmatpush1.msk.msra.mxu1 %vm1418_vm7, %v1459_v14  ;;  %v941_v62 = vsel %vm409_vm0, %v916_v37, %v929_v60 }
 0x3a6   : > { %1135 = vmatmul.mubr.msk.f32.vlgmr.msra.gmra.mxu1 %vm547_vm8, %v783_v58  ;;  %1137 = vmatpush1.msk.msra.mxu0 %vm409_vm0, %v939_v61 }
 0x3a7   : > { %988 = vmatprep.subr.mxu0 %v942_v63 }
 0x3a8   : > { %989 = vmatpush1.msra.mxu0 %v941_v62 }
 0x3a9   : > { %1138 = vmatmul.mubr.msk.f32.vlgmr.msra.gmra.mxu0 %vm950_vm13, %v943_v1 }
 0x3b0   : > { %v788_v10 = vpop.permute.xlu0 %787 }
 0x3b1   : > { %v545_v35 = vpop.permute.xlu1 %544 }
 0x3b5   : > { %v948_v14 = vpop.permute.xlu1 %947 }
 0x3ed   : > { %v617_v2 = vpop.f32.mrf.mxu1 }
 0x3ee   : > { %v618_v3 = vadd.f32 %v617_v2, %v545_v35 }
 0x3ef   : > { %v619_v4 = vpop.f32.mrf.mxu1 }
 0x3f0   : > { %vm622_vm14 = vcmp.ge.f32.partialorder %v618_v3, 0.0  ;;  %v624_v5 = vmul.f32 0.01, %v618_v3  ;;  %v620_v6 = vadd.f32 %v619_v4, %v545_v35 }
 0x3f2   : > { %v626_v7 = vsel %vm622_vm14, %v618_v3, %v624_v5  ;;  %vm623_vm15 = vcmp.ge.f32.partialorder %v620_v6, 0.0  ;;  %v625_v8 = vmul.f32 0.01, %v620_v6 }
 0x3f3   : > { %1035 = vst [vmem:[%s1531_s24] sm:$0xff] %v626_v7 }
 0x3f4   : > { %v627_v9 = vsel %vm623_vm15, %v620_v6, %v625_v8 }
 0x3f5   : > { %1036 = vst [vmem:[%s1531_s24 + $0x8] sm:$0xff] %v627_v9 }
 0x466   : > { %v859_v11 = vpop.f32.mrf.mxu1 }
 0x467   : > { %v860_v12 = vadd.f32 %v859_v11, %v788_v10 }
 0x468   : > { %v861_v13 = vpop.f32.mrf.mxu1 }
 0x469   : > { %vm864_vm0 = vcmp.ge.f32.partialorder %v860_v12, 0.0  ;;  %v866_v15 = vmul.f32 0.01, %v860_v12  ;;  %v862_v16 = vadd.f32 %v861_v13, %v788_v10  ;;  %v1024_v17 = vpop.f32.mrf.mxu0 }
 0x46a   : > { %v1025_v18 = vadd.f32 %v1024_v17, %v948_v14 }
 0x46b   : > { %v868_v19 = vsel %vm864_vm0, %v860_v12, %v866_v15  ;;  %vm865_vm1 = vcmp.ge.f32.partialorder %v862_v16, 0.0  ;;  %v867_v20 = vmul.f32 0.01, %v862_v16  ;;  %v1026_v21 = vpop.f32.mrf.mxu0 }
 0x46c   : > { %1037 = vst [vmem:[%s1531_s24 + $0x10] sm:$0xff] %v868_v19  ;;  %vm1029_vm2 = vcmp.ge.f32.partialorder %v1025_v18, 0.0  ;;  %v1031_v22 = vmul.f32 0.01, %v1025_v18  ;;  %v1027_v23 = vadd.f32 %v1026_v21, %v948_v14 }
 0x46d   : > { %v869_v24 = vsel %vm865_vm1, %v862_v16, %v867_v20 }
 0x46e   : > { %1038 = vst [vmem:[%s1531_s24 + $0x18] sm:$0xff] %v869_v24  ;;  %v1033_v25 = vsel %vm1029_vm2, %v1025_v18, %v1031_v22  ;;  %vm1030_vm3 = vcmp.ge.f32.partialorder %v1027_v23, 0.0  ;;  %v1032_v26 = vmul.f32 0.01, %v1027_v23 }
 0x46f   : > { %1039 = vst [vmem:[%s1531_s24 + $0x20] sm:$0xff] %v1033_v25 }
 0x470   : > { %v1034_v27 = vsel %vm1030_vm3, %v1027_v23, %v1032_v26 }
 0x471   : > { %1040 = vst [vmem:[%s1531_s24 + $0x28] sm:$0xff] %v1034_v27 }
 0x472   : > { %1206 = shalt.err (!%p1203_p3)
}
 0x473   : > { %s1207_s16 = scalar_lea.hbm %s1542_s13, 768  ;;  %s1211_s22 = scalar_lea.hbm %s1602_s11, 1536 }
 0x474   : > { %p1208_p4 = scmp.ne.s32.totalorder %s1542_s13, %s1207_s16  ;;  %p1212_p9 = scmp.lt.s32.totalorder %s1542_s13, %s1602_s11 }
 0x475   : > { %p1213_p10 = scmp.lt.s32.totalorder %s1211_s22, %s1207_s16 }
 0x476   : > { %p1209_p7 = pnand %p1208_p4, %p1360_p5 }
 0x477   : > { %p1214_p11 = por %p1213_p10, %p1212_p9 }
 0x478   : > { %p1210_p8 = pneg %p1209_p7 }
 0x47a   : > { %p1215_p12 = pnand %p1214_p11, %p1210_p8 }
 0x47c   : > { %1218 = shalt.err (!%p1215_p12)
}
 0x47d   : > { %s1261_s15 = smov 256   ;;  %s1610_s12 = smov 16  }
 0x47e   : > { %1145 = dma.vmem_to_hbm [thread:$0]  (%p1360_p5), %s1545_s29, 768, %s1542_s13, %s1550_s14, %s1261_s15, %s1261_s15, %s1610_s12  }
 0x47f PF: > { %p1151_p13 = scmp.ge.s32.totalorder %s1253_s20, 2  ;;  %s1070_s25 = sand.u32 1, %s1241_s17  }
 0x480   : > { %s1071_s0 = scalar_lea.sflag [#allocation3], %s1070_s25 }
 0x481   : > { %p1148_p0 = pnand %p1151_p13, %p1364_p6 }
 0x483   : > { %p1149_p1 = pneg %p1148_p0 }
 0x485   : > { %1236 = dma.done.wait (%p1149_p1), %s1071_s0, 768  }
 0x486   : > { %1238 = vsyncadd (%p1149_p1), %s1071_s0, 4294966528  ;;  %p21_p2 = scmp.ge.s32.totalorder %s1347_s23, 4   ;;  %s1611_s17 = smov %s1245_s18 }
 0x487   : > { %s1612_s18 = smov %s1249_s19  ;;  %s1613_s19 = smov %s1358_s26 }
 0x488   : > { %s1614_s20 = smov %s1347_s23  ;;  %23 = sbr.rel (!%p21_p2) target bundleno = 5 (0x5), region = 99 }
 0x48d   :  { %1076 = vsyncpa [#allocation3], 1 }
 0x48e   :  { %1078 = vsyncpa [#allocation3 + $0x1], 1 }

</bundles_post_ra>
